<compile_context>
chip_gen: v6e
topology: v6e:2x2x1
jax: 0.10.0
libtpu: 0.0.40
codegen_flags: <defaults>
</compile_context>

<pallas_src>
import math

import jax
import jax.numpy as jnp
import numpy as np
from jax import lax
from jax.experimental import pallas as pl
from jax.experimental.pallas import tpu as pltpu

COLUMNS = ['revenue', 'ebit', 'netinc', 'ncfo', 'fcf', 'assets', 'liabilities']
INPUT_SIZE = len(COLUMNS)  # 7


def gru_linear_kernel(x_ref, wi_ref, wh_ref, bi_ref, bh_ref,
                      wout_ref, bout_ref, out_ref, hs_scratch):
    """Fused single-layer GRU recurrence + Linear(H, 1).

    x_ref:    (T, B, D)   VMEM
    wi_ref:   (D, 3H)     fused input-side gate weights, columns [r | z | n]
    wh_ref:   (H, 3H)     fused hidden-side gate weights, columns [r | z | n]
    bi_ref:   (1, 3H)     fused input-side biases  (b_ir | b_iz | b_in)
    bh_ref:   (1, 3H)     fused hidden-side biases (b_hr | b_hz | b_hn)
    wout_ref: (1, H)      final Linear weight
    bout_ref: (1, 1)      final Linear bias
    out_ref:  (T, B)
    hs_scratch: (T, B, H) per-step hidden states (write-only inside the loop)
    """
    T, B, D = x_ref.shape
    H = wh_ref.shape[0]

    # Hoist weight/bias reads out of the recurrence.
    wh = wh_ref[...]                                              # (H, 3H)
    bh = bh_ref[...]                                              # (1, 3H)

    # Input-side projection for all timesteps at once (off the serial path).
    x_all = x_ref[...].reshape(T * B, D)                          # (T*B, D)
    x_proj = (jnp.dot(x_all, wi_ref[...],
                      preferred_element_type=jnp.float32)
              + bi_ref[...]).reshape(T, B, 3 * H)                 # (T, B, 3H)

    # Serial GRU recurrence, fully unrolled (T is static); h stays in registers.
    h = jnp.zeros((B, H), jnp.float32)
    for t in range(T):
        xp = x_proj[t]                                            # (B, 3H)
        hp = jnp.dot(h, wh, preferred_element_type=jnp.float32) + bh   # (B, 3H)
        rz = jax.nn.sigmoid(xp[:, :2 * H] + hp[:, :2 * H])        # (B, 2H) one sigmoid
        r = rz[:, :H]
        z = rz[:, H:]
        n = jnp.tanh(xp[:, 2 * H:] + r * hp[:, 2 * H:])           # (B, H)
        h = (1.0 - z) * n + z * h
        hs_scratch[t] = h                                         # write-only

    # Single output projection + single store after the loop.
    hs = hs_scratch[...]                                          # (T, B, H)
    wout = wout_ref[...].reshape(1, 1, H)                         # (1, 1, H)
    out_ref[...] = jnp.sum(hs * wout, axis=-1) + bout_ref[...]    # (T, B)


def gru_linear_forward(x_btd, params):
    """x_btd: (B, T, D) float32 (batch_first, like the PyTorch module). Returns (B, T, 1)."""
    B, T, D = x_btd.shape
    H = params['wh'].shape[0]
    x_tbd = jnp.transpose(x_btd, (1, 0, 2))                       # time-major for the kernel

    operands = (
        x_tbd,
        params['wi'], params['wh'], params['bi'], params['bh'],
        params['wout'], params['bout'],
    )
    vmem_spec = pl.BlockSpec(memory_space=pltpu.MemorySpace.VMEM)

    out_tb = pl.pallas_call(
        gru_linear_kernel,
        out_shape=jax.ShapeDtypeStruct((T, B), jnp.float32),
        in_specs=[vmem_spec] * len(operands),
        out_specs=vmem_spec,
        scratch_shapes=[pltpu.VMEM((T, B, H), jnp.float32)],
    )(*operands)

    return jnp.transpose(out_tb, (1, 0))[:, :, None]              # (B, T, 1)


def init_params(key, hidden_size):
    """Deterministic init matching PyTorch GRU/Linear parameter shapes (gate order r, z, n)."""
    H, D = hidden_size, INPUT_SIZE
    k = 1.0 / math.sqrt(H)
    keys = jax.random.split(key, 6)
    w_ih = jax.random.uniform(keys[0], (3 * H, D), jnp.float32, -k, k)
    w_hh = jax.random.uniform(keys[1], (3 * H, H), jnp.float32, -k, k)
    b_ih = jax.random.uniform(keys[2], (3 * H,), jnp.float32, -k, k)
    b_hh = jax.random.uniform(keys[3], (3 * H,), jnp.float32, -k, k)
    w_out = jax.random.uniform(keys[4], (1, H), jnp.float32, -k, k)
    b_out = jax.random.uniform(keys[5], (1,), jnp.float32, -k, k)

    return {
        'wi': w_ih.T,                    # (D, 3H), columns [r | z | n]
        'wh': w_hh.T,                    # (H, 3H)
        'bi': b_ih.reshape(1, 3 * H),    # (1, 3H)
        'bh': b_hh.reshape(1, 3 * H),    # (1, 3H)
        'wout': w_out,                   # (1, H)
        'bout': b_out.reshape(1, 1),     # (1, 1)
    }


def reference_forward(x_btd, params):
    """Pure-JAX reference of torch.nn.GRU(batch_first=True) + Linear(H, 1)."""
    B, T, D = x_btd.shape
    H = params['wh'].shape[0]
    wi, wh, bi, bh = params['wi'], params['wh'], params['bi'], params['bh']

    def cell(h, x_t):
        xp = x_t @ wi + bi
        hp = h @ wh + bh
        r = jax.nn.sigmoid(xp[:, :H] + hp[:, :H])
        z = jax.nn.sigmoid(xp[:, H:2 * H] + hp[:, H:2 * H])
        n = jnp.tanh(xp[:, 2 * H:] + r * hp[:, 2 * H:])
        h_new = (1.0 - z) * n + z * h
        return h_new, h_new

    x_tbd = jnp.transpose(x_btd, (1, 0, 2))
    _, hs = lax.scan(cell, jnp.zeros((B, H), jnp.float32), x_tbd)   # (T, B, H)
    out = jnp.einsum('tbh,oh->tbo', hs, params['wout']) + params['bout'][0, 0]
    return jnp.transpose(out, (1, 0, 2))                            # (B, T, 1)


if __name__ == "__main__":
    key = jax.random.PRNGKey(0)
    k_x, k_p = jax.random.split(key)

    batch, seq, hidden = 2, 8, 32
    x = jax.random.normal(k_x, (batch, seq, INPUT_SIZE), jnp.float32)
    params = init_params(k_p, hidden)

    out = jax.block_until_ready(gru_linear_forward(x, params))
    ref = jax.block_until_ready(reference_forward(x, params))

    np.testing.assert_allclose(np.asarray(out), np.asarray(ref), rtol=1e-5, atol=1e-5)
    assert out.shape == (batch, seq, 1)

    print("KERNEL_OK")
</pallas_src>

<mosaic_0001>
module attributes {stable_mosaic.version = 11 : i64} {
  func.func @gru_linear_kernel(%arg0: memref<8x2x7xf32, #tpu.memory_space<vmem>>, %arg1: memref<7x96xf32, #tpu.memory_space<vmem>>, %arg2: memref<32x96xf32, #tpu.memory_space<vmem>>, %arg3: memref<1x96xf32, #tpu.memory_space<vmem>>, %arg4: memref<1x96xf32, #tpu.memory_space<vmem>>, %arg5: memref<1x32xf32, #tpu.memory_space<vmem>>, %arg6: memref<1x1xf32, #tpu.memory_space<vmem>>, %arg7: memref<8x2xf32, #tpu.memory_space<vmem>>, %arg8: memref<8x2x32xf32, #tpu.memory_space<vmem>>) attributes {dimension_semantics = [], scalar_prefetch = 0 : i64, scratch_operands = 1 : i64, tpu.core_type = #tpu.core_type<tc>} {
    %c0 = arith.constant 0 : index
    %c0_0 = arith.constant 0 : index
    %0 = vector.load %arg2[%c0, %c0_0] : memref<32x96xf32, #tpu.memory_space<vmem>>, vector<32x96xf32>
    %c0_1 = arith.constant 0 : index
    %c0_2 = arith.constant 0 : index
    %1 = vector.load %arg4[%c0_1, %c0_2] : memref<1x96xf32, #tpu.memory_space<vmem>>, vector<1x96xf32>
    %c0_3 = arith.constant 0 : index
    %c0_4 = arith.constant 0 : index
    %c0_5 = arith.constant 0 : index
    %2 = vector.load %arg0[%c0_3, %c0_4, %c0_5] : memref<8x2x7xf32, #tpu.memory_space<vmem>>, vector<8x2x7xf32>
    %3 = vector.shape_cast %2 : vector<8x2x7xf32> to vector<16x7xf32>
    %c0_6 = arith.constant 0 : index
    %c0_7 = arith.constant 0 : index
    %4 = vector.load %arg1[%c0_6, %c0_7] : memref<7x96xf32, #tpu.memory_space<vmem>>, vector<7x96xf32>
    %cst = arith.constant dense<0.000000e+00> : vector<16x96xf32>
    %5 = tpu.matmul %3, %4, %cst {dimension_numbers = #tpu.dot_dimension_numbers<[1], [0], [0], [1], [0, 0, 1, 1], [], []>} : vector<16x7xf32>, vector<7x96xf32>, vector<16x96xf32> -> vector<16x96xf32>
    %c0_8 = arith.constant 0 : index
    %c0_9 = arith.constant 0 : index
    %6 = vector.load %arg3[%c0_8, %c0_9] : memref<1x96xf32, #tpu.memory_space<vmem>>, vector<1x96xf32>
    %7 = vector.broadcast %6 : vector<1x96xf32> to vector<16x96xf32>
    %8 = arith.addf %5, %7 : vector<16x96xf32>
    %9 = vector.shape_cast %8 : vector<16x96xf32> to vector<8x2x96xf32>
    %cst_10 = arith.constant 0.000000e+00 : f32
    %10 = vector.broadcast %cst_10 : f32 to vector<2x32xf32>
    %11 = vector.extract_strided_slice %9 {offsets = [0, 0, 0], sizes = [1, 2, 96], strides = [1, 1, 1]} : vector<8x2x96xf32> to vector<1x2x96xf32>
    %12 = vector.shape_cast %11 : vector<1x2x96xf32> to vector<2x96xf32>
    %cst_11 = arith.constant dense<0.000000e+00> : vector<2x96xf32>
    %13 = tpu.matmul %10, %0, %cst_11 {dimension_numbers = #tpu.dot_dimension_numbers<[1], [0], [0], [1], [0, 0, 1, 1], [], []>} : vector<2x32xf32>, vector<32x96xf32>, vector<2x96xf32> -> vector<2x96xf32>
    %14 = vector.broadcast %1 : vector<1x96xf32> to vector<2x96xf32>
    %15 = arith.addf %13, %14 : vector<2x96xf32>
    %16 = vector.extract_strided_slice %12 {offsets = [0, 0], sizes = [2, 64], strides = [1, 1]} : vector<2x96xf32> to vector<2x64xf32>
    %17 = vector.extract_strided_slice %15 {offsets = [0, 0], sizes = [2, 64], strides = [1, 1]} : vector<2x96xf32> to vector<2x64xf32>
    %18 = arith.addf %16, %17 : vector<2x64xf32>
    %19 = arith.negf %18 : vector<2x64xf32>
    %20 = math.exp %19 : vector<2x64xf32>
    %cst_12 = arith.constant 1.000000e+00 : f32
    %21 = vector.broadcast %cst_12 : f32 to vector<2x64xf32>
    %22 = arith.addf %21, %20 : vector<2x64xf32>
    %23 = arith.divf %21, %22 : vector<2x64xf32>
    %24 = vector.extract_strided_slice %23 {offsets = [0, 0], sizes = [2, 32], strides = [1, 1]} : vector<2x64xf32> to vector<2x32xf32>
    %25 = vector.extract_strided_slice %23 {offsets = [0, 32], sizes = [2, 32], strides = [1, 1]} : vector<2x64xf32> to vector<2x32xf32>
    %26 = vector.extract_strided_slice %12 {offsets = [0, 64], sizes = [2, 32], strides = [1, 1]} : vector<2x96xf32> to vector<2x32xf32>
    %27 = vector.extract_strided_slice %15 {offsets = [0, 64], sizes = [2, 32], strides = [1, 1]} : vector<2x96xf32> to vector<2x32xf32>
    %28 = arith.mulf %24, %27 : vector<2x32xf32>
    %29 = arith.addf %26, %28 : vector<2x32xf32>
    %30 = math.tanh %29 : vector<2x32xf32>
    %cst_13 = arith.constant 1.000000e+00 : f32
    %31 = vector.broadcast %cst_13 : f32 to vector<2x32xf32>
    %32 = arith.subf %31, %25 : vector<2x32xf32>
    %33 = arith.mulf %32, %30 : vector<2x32xf32>
    %34 = arith.mulf %25, %10 : vector<2x32xf32>
    %35 = arith.addf %33, %34 : vector<2x32xf32>
    %c0_14 = arith.constant 0 : index
    %c0_15 = arith.constant 0 : index
    %c0_16 = arith.constant 0 : index
    %36 = vector.load %arg8[%c0_14, %c0_15, %c0_16] : memref<8x2x32xf32, #tpu.memory_space<vmem>>, vector<1x2x32xf32>
    %37 = vector.shape_cast %36 : vector<1x2x32xf32> to vector<2x32xf32>
    %38 = vector.shape_cast %35 : vector<2x32xf32> to vector<1x2x32xf32>
    tpu.vector_store %arg8[%c0_14, %c0_15, %c0_16], %38 {strides = array<i32>} : memref<8x2x32xf32, #tpu.memory_space<vmem>>, vector<1x2x32xf32>,
    %39 = vector.extract_strided_slice %9 {offsets = [1, 0, 0], sizes = [1, 2, 96], strides = [1, 1, 1]} : vector<8x2x96xf32> to vector<1x2x96xf32>
    %40 = vector.shape_cast %39 : vector<1x2x96xf32> to vector<2x96xf32>
    %cst_17 = arith.constant dense<0.000000e+00> : vector<2x96xf32>
    %41 = tpu.matmul %35, %0, %cst_17 {dimension_numbers = #tpu.dot_dimension_numbers<[1], [0], [0], [1], [0, 0, 1, 1], [], []>} : vector<2x32xf32>, vector<32x96xf32>, vector<2x96xf32> -> vector<2x96xf32>
    %42 = vector.broadcast %1 : vector<1x96xf32> to vector<2x96xf32>
    %43 = arith.addf %41, %42 : vector<2x96xf32>
    %44 = vector.extract_strided_slice %40 {offsets = [0, 0], sizes = [2, 64], strides = [1, 1]} : vector<2x96xf32> to vector<2x64xf32>
    %45 = vector.extract_strided_slice %43 {offsets = [0, 0], sizes = [2, 64], strides = [1, 1]} : vector<2x96xf32> to vector<2x64xf32>
    %46 = arith.addf %44, %45 : vector<2x64xf32>
    %47 = arith.negf %46 : vector<2x64xf32>
    %48 = math.exp %47 : vector<2x64xf32>
    %cst_18 = arith.constant 1.000000e+00 : f32
    %49 = vector.broadcast %cst_18 : f32 to vector<2x64xf32>
    %50 = arith.addf %49, %48 : vector<2x64xf32>
    %51 = arith.divf %49, %50 : vector<2x64xf32>
    %52 = vector.extract_strided_slice %51 {offsets = [0, 0], sizes = [2, 32], strides = [1, 1]} : vector<2x64xf32> to vector<2x32xf32>
    %53 = vector.extract_strided_slice %51 {offsets = [0, 32], sizes = [2, 32], strides = [1, 1]} : vector<2x64xf32> to vector<2x32xf32>
    %54 = vector.extract_strided_slice %40 {offsets = [0, 64], sizes = [2, 32], strides = [1, 1]} : vector<2x96xf32> to vector<2x32xf32>
    %55 = vector.extract_strided_slice %43 {offsets = [0, 64], sizes = [2, 32], strides = [1, 1]} : vector<2x96xf32> to vector<2x32xf32>
    %56 = arith.mulf %52, %55 : vector<2x32xf32>
    %57 = arith.addf %54, %56 : vector<2x32xf32>
    %58 = math.tanh %57 : vector<2x32xf32>
    %cst_19 = arith.constant 1.000000e+00 : f32
    %59 = vector.broadcast %cst_19 : f32 to vector<2x32xf32>
    %60 = arith.subf %59, %53 : vector<2x32xf32>
    %61 = arith.mulf %60, %58 : vector<2x32xf32>
    %62 = arith.mulf %53, %35 : vector<2x32xf32>
    %63 = arith.addf %61, %62 : vector<2x32xf32>
    %c1 = arith.constant 1 : index
    %c0_20 = arith.constant 0 : index
    %c0_21 = arith.constant 0 : index
    %64 = vector.load %arg8[%c1, %c0_20, %c0_21] : memref<8x2x32xf32, #tpu.memory_space<vmem>>, vector<1x2x32xf32>
    %65 = vector.shape_cast %64 : vector<1x2x32xf32> to vector<2x32xf32>
    %66 = vector.shape_cast %63 : vector<2x32xf32> to vector<1x2x32xf32>
    tpu.vector_store %arg8[%c1, %c0_20, %c0_21], %66 {strides = array<i32>} : memref<8x2x32xf32, #tpu.memory_space<vmem>>, vector<1x2x32xf32>,
    %67 = vector.extract_strided_slice %9 {offsets = [2, 0, 0], sizes = [1, 2, 96], strides = [1, 1, 1]} : vector<8x2x96xf32> to vector<1x2x96xf32>
    %68 = vector.shape_cast %67 : vector<1x2x96xf32> to vector<2x96xf32>
    %cst_22 = arith.constant dense<0.000000e+00> : vector<2x96xf32>
    %69 = tpu.matmul %63, %0, %cst_22 {dimension_numbers = #tpu.dot_dimension_numbers<[1], [0], [0], [1], [0, 0, 1, 1], [], []>} : vector<2x32xf32>, vector<32x96xf32>, vector<2x96xf32> -> vector<2x96xf32>
    %70 = vector.broadcast %1 : vector<1x96xf32> to vector<2x96xf32>
    %71 = arith.addf %69, %70 : vector<2x96xf32>
    %72 = vector.extract_strided_slice %68 {offsets = [0, 0], sizes = [2, 64], strides = [1, 1]} : vector<2x96xf32> to vector<2x64xf32>
    %73 = vector.extract_strided_slice %71 {offsets = [0, 0], sizes = [2, 64], strides = [1, 1]} : vector<2x96xf32> to vector<2x64xf32>
    %74 = arith.addf %72, %73 : vector<2x64xf32>
    %75 = arith.negf %74 : vector<2x64xf32>
    %76 = math.exp %75 : vector<2x64xf32>
    %cst_23 = arith.constant 1.000000e+00 : f32
    %77 = vector.broadcast %cst_23 : f32 to vector<2x64xf32>
    %78 = arith.addf %77, %76 : vector<2x64xf32>
    %79 = arith.divf %77, %78 : vector<2x64xf32>
    %80 = vector.extract_strided_slice %79 {offsets = [0, 0], sizes = [2, 32], strides = [1, 1]} : vector<2x64xf32> to vector<2x32xf32>
    %81 = vector.extract_strided_slice %79 {offsets = [0, 32], sizes = [2, 32], strides = [1, 1]} : vector<2x64xf32> to vector<2x32xf32>
    %82 = vector.extract_strided_slice %68 {offsets = [0, 64], sizes = [2, 32], strides = [1, 1]} : vector<2x96xf32> to vector<2x32xf32>
    %83 = vector.extract_strided_slice %71 {offsets = [0, 64], sizes = [2, 32], strides = [1, 1]} : vector<2x96xf32> to vector<2x32xf32>
    %84 = arith.mulf %80, %83 : vector<2x32xf32>
    %85 = arith.addf %82, %84 : vector<2x32xf32>
    %86 = math.tanh %85 : vector<2x32xf32>
    %cst_24 = arith.constant 1.000000e+00 : f32
    %87 = vector.broadcast %cst_24 : f32 to vector<2x32xf32>
    %88 = arith.subf %87, %81 : vector<2x32xf32>
    %89 = arith.mulf %88, %86 : vector<2x32xf32>
    %90 = arith.mulf %81, %63 : vector<2x32xf32>
    %91 = arith.addf %89, %90 : vector<2x32xf32>
    %c2 = arith.constant 2 : index
    %c0_25 = arith.constant 0 : index
    %c0_26 = arith.constant 0 : index
    %92 = vector.load %arg8[%c2, %c0_25, %c0_26] : memref<8x2x32xf32, #tpu.memory_space<vmem>>, vector<1x2x32xf32>
    %93 = vector.shape_cast %92 : vector<1x2x32xf32> to vector<2x32xf32>
    %94 = vector.shape_cast %91 : vector<2x32xf32> to vector<1x2x32xf32>
    tpu.vector_store %arg8[%c2, %c0_25, %c0_26], %94 {strides = array<i32>} : memref<8x2x32xf32, #tpu.memory_space<vmem>>, vector<1x2x32xf32>,
    %95 = vector.extract_strided_slice %9 {offsets = [3, 0, 0], sizes = [1, 2, 96], strides = [1, 1, 1]} : vector<8x2x96xf32> to vector<1x2x96xf32>
    %96 = vector.shape_cast %95 : vector<1x2x96xf32> to vector<2x96xf32>
    %cst_27 = arith.constant dense<0.000000e+00> : vector<2x96xf32>
    %97 = tpu.matmul %91, %0, %cst_27 {dimension_numbers = #tpu.dot_dimension_numbers<[1], [0], [0], [1], [0, 0, 1, 1], [], []>} : vector<2x32xf32>, vector<32x96xf32>, vector<2x96xf32> -> vector<2x96xf32>
    %98 = vector.broadcast %1 : vector<1x96xf32> to vector<2x96xf32>
    %99 = arith.addf %97, %98 : vector<2x96xf32>
    %100 = vector.extract_strided_slice %96 {offsets = [0, 0], sizes = [2, 64], strides = [1, 1]} : vector<2x96xf32> to vector<2x64xf32>
    %101 = vector.extract_strided_slice %99 {offsets = [0, 0], sizes = [2, 64], strides = [1, 1]} : vector<2x96xf32> to vector<2x64xf32>
    %102 = arith.addf %100, %101 : vector<2x64xf32>
    %103 = arith.negf %102 : vector<2x64xf32>
    %104 = math.exp %103 : vector<2x64xf32>
    %cst_28 = arith.constant 1.000000e+00 : f32
    %105 = vector.broadcast %cst_28 : f32 to vector<2x64xf32>
    %106 = arith.addf %105, %104 : vector<2x64xf32>
    %107 = arith.divf %105, %106 : vector<2x64xf32>
    %108 = vector.extract_strided_slice %107 {offsets = [0, 0], sizes = [2, 32], strides = [1, 1]} : vector<2x64xf32> to vector<2x32xf32>
    %109 = vector.extract_strided_slice %107 {offsets = [0, 32], sizes = [2, 32], strides = [1, 1]} : vector<2x64xf32> to vector<2x32xf32>
    %110 = vector.extract_strided_slice %96 {offsets = [0, 64], sizes = [2, 32], strides = [1, 1]} : vector<2x96xf32> to vector<2x32xf32>
    %111 = vector.extract_strided_slice %99 {offsets = [0, 64], sizes = [2, 32], strides = [1, 1]} : vector<2x96xf32> to vector<2x32xf32>
    %112 = arith.mulf %108, %111 : vector<2x32xf32>
    %113 = arith.addf %110, %112 : vector<2x32xf32>
    %114 = math.tanh %113 : vector<2x32xf32>
    %cst_29 = arith.constant 1.000000e+00 : f32
    %115 = vector.broadcast %cst_29 : f32 to vector<2x32xf32>
    %116 = arith.subf %115, %109 : vector<2x32xf32>
    %117 = arith.mulf %116, %114 : vector<2x32xf32>
    %118 = arith.mulf %109, %91 : vector<2x32xf32>
    %119 = arith.addf %117, %118 : vector<2x32xf32>
    %c3 = arith.constant 3 : index
    %c0_30 = arith.constant 0 : index
    %c0_31 = arith.constant 0 : index
    %120 = vector.load %arg8[%c3, %c0_30, %c0_31] : memref<8x2x32xf32, #tpu.memory_space<vmem>>, vector<1x2x32xf32>
    %121 = vector.shape_cast %120 : vector<1x2x32xf32> to vector<2x32xf32>
    %122 = vector.shape_cast %119 : vector<2x32xf32> to vector<1x2x32xf32>
    tpu.vector_store %arg8[%c3, %c0_30, %c0_31], %122 {strides = array<i32>} : memref<8x2x32xf32, #tpu.memory_space<vmem>>, vector<1x2x32xf32>,
    %123 = vector.extract_strided_slice %9 {offsets = [4, 0, 0], sizes = [1, 2, 96], strides = [1, 1, 1]} : vector<8x2x96xf32> to vector<1x2x96xf32>
    %124 = vector.shape_cast %123 : vector<1x2x96xf32> to vector<2x96xf32>
    %cst_32 = arith.constant dense<0.000000e+00> : vector<2x96xf32>
    %125 = tpu.matmul %119, %0, %cst_32 {dimension_numbers = #tpu.dot_dimension_numbers<[1], [0], [0], [1], [0, 0, 1, 1], [], []>} : vector<2x32xf32>, vector<32x96xf32>, vector<2x96xf32> -> vector<2x96xf32>
    %126 = vector.broadcast %1 : vector<1x96xf32> to vector<2x96xf32>
    %127 = arith.addf %125, %126 : vector<2x96xf32>
    %128 = vector.extract_strided_slice %124 {offsets = [0, 0], sizes = [2, 64], strides = [1, 1]} : vector<2x96xf32> to vector<2x64xf32>
    %129 = vector.extract_strided_slice %127 {offsets = [0, 0], sizes = [2, 64], strides = [1, 1]} : vector<2x96xf32> to vector<2x64xf32>
    %130 = arith.addf %128, %129 : vector<2x64xf32>
    %131 = arith.negf %130 : vector<2x64xf32>
    %132 = math.exp %131 : vector<2x64xf32>
    %cst_33 = arith.constant 1.000000e+00 : f32
    %133 = vector.broadcast %cst_33 : f32 to vector<2x64xf32>
    %134 = arith.addf %133, %132 : vector<2x64xf32>
    %135 = arith.divf %133, %134 : vector<2x64xf32>
    %136 = vector.extract_strided_slice %135 {offsets = [0, 0], sizes = [2, 32], strides = [1, 1]} : vector<2x64xf32> to vector<2x32xf32>
    %137 = vector.extract_strided_slice %135 {offsets = [0, 32], sizes = [2, 32], strides = [1, 1]} : vector<2x64xf32> to vector<2x32xf32>
    %138 = vector.extract_strided_slice %124 {offsets = [0, 64], sizes = [2, 32], strides = [1, 1]} : vector<2x96xf32> to vector<2x32xf32>
    %139 = vector.extract_strided_slice %127 {offsets = [0, 64], sizes = [2, 32], strides = [1, 1]} : vector<2x96xf32> to vector<2x32xf32>
    %140 = arith.mulf %136, %139 : vector<2x32xf32>
    %141 = arith.addf %138, %140 : vector<2x32xf32>
    %142 = math.tanh %141 : vector<2x32xf32>
    %cst_34 = arith.constant 1.000000e+00 : f32
    %143 = vector.broadcast %cst_34 : f32 to vector<2x32xf32>
    %144 = arith.subf %143, %137 : vector<2x32xf32>
    %145 = arith.mulf %144, %142 : vector<2x32xf32>
    %146 = arith.mulf %137, %119 : vector<2x32xf32>
    %147 = arith.addf %145, %146 : vector<2x32xf32>
    %c4 = arith.constant 4 : index
    %c0_35 = arith.constant 0 : index
    %c0_36 = arith.constant 0 : index
    %148 = vector.load %arg8[%c4, %c0_35, %c0_36] : memref<8x2x32xf32, #tpu.memory_space<vmem>>, vector<1x2x32xf32>
    %149 = vector.shape_cast %148 : vector<1x2x32xf32> to vector<2x32xf32>
    %150 = vector.shape_cast %147 : vector<2x32xf32> to vector<1x2x32xf32>
    tpu.vector_store %arg8[%c4, %c0_35, %c0_36], %150 {strides = array<i32>} : memref<8x2x32xf32, #tpu.memory_space<vmem>>, vector<1x2x32xf32>,
    %151 = vector.extract_strided_slice %9 {offsets = [5, 0, 0], sizes = [1, 2, 96], strides = [1, 1, 1]} : vector<8x2x96xf32> to vector<1x2x96xf32>
    %152 = vector.shape_cast %151 : vector<1x2x96xf32> to vector<2x96xf32>
    %cst_37 = arith.constant dense<0.000000e+00> : vector<2x96xf32>
    %153 = tpu.matmul %147, %0, %cst_37 {dimension_numbers = #tpu.dot_dimension_numbers<[1], [0], [0], [1], [0, 0, 1, 1], [], []>} : vector<2x32xf32>, vector<32x96xf32>, vector<2x96xf32> -> vector<2x96xf32>
    %154 = vector.broadcast %1 : vector<1x96xf32> to vector<2x96xf32>
    %155 = arith.addf %153, %154 : vector<2x96xf32>
    %156 = vector.extract_strided_slice %152 {offsets = [0, 0], sizes = [2, 64], strides = [1, 1]} : vector<2x96xf32> to vector<2x64xf32>
    %157 = vector.extract_strided_slice %155 {offsets = [0, 0], sizes = [2, 64], strides = [1, 1]} : vector<2x96xf32> to vector<2x64xf32>
    %158 = arith.addf %156, %157 : vector<2x64xf32>
    %159 = arith.negf %158 : vector<2x64xf32>
    %160 = math.exp %159 : vector<2x64xf32>
    %cst_38 = arith.constant 1.000000e+00 : f32
    %161 = vector.broadcast %cst_38 : f32 to vector<2x64xf32>
    %162 = arith.addf %161, %160 : vector<2x64xf32>
    %163 = arith.divf %161, %162 : vector<2x64xf32>
    %164 = vector.extract_strided_slice %163 {offsets = [0, 0], sizes = [2, 32], strides = [1, 1]} : vector<2x64xf32> to vector<2x32xf32>
    %165 = vector.extract_strided_slice %163 {offsets = [0, 32], sizes = [2, 32], strides = [1, 1]} : vector<2x64xf32> to vector<2x32xf32>
    %166 = vector.extract_strided_slice %152 {offsets = [0, 64], sizes = [2, 32], strides = [1, 1]} : vector<2x96xf32> to vector<2x32xf32>
    %167 = vector.extract_strided_slice %155 {offsets = [0, 64], sizes = [2, 32], strides = [1, 1]} : vector<2x96xf32> to vector<2x32xf32>
    %168 = arith.mulf %164, %167 : vector<2x32xf32>
    %169 = arith.addf %166, %168 : vector<2x32xf32>
    %170 = math.tanh %169 : vector<2x32xf32>
    %cst_39 = arith.constant 1.000000e+00 : f32
    %171 = vector.broadcast %cst_39 : f32 to vector<2x32xf32>
    %172 = arith.subf %171, %165 : vector<2x32xf32>
    %173 = arith.mulf %172, %170 : vector<2x32xf32>
    %174 = arith.mulf %165, %147 : vector<2x32xf32>
    %175 = arith.addf %173, %174 : vector<2x32xf32>
    %c5 = arith.constant 5 : index
    %c0_40 = arith.constant 0 : index
    %c0_41 = arith.constant 0 : index
    %176 = vector.load %arg8[%c5, %c0_40, %c0_41] : memref<8x2x32xf32, #tpu.memory_space<vmem>>, vector<1x2x32xf32>
    %177 = vector.shape_cast %176 : vector<1x2x32xf32> to vector<2x32xf32>
    %178 = vector.shape_cast %175 : vector<2x32xf32> to vector<1x2x32xf32>
    tpu.vector_store %arg8[%c5, %c0_40, %c0_41], %178 {strides = array<i32>} : memref<8x2x32xf32, #tpu.memory_space<vmem>>, vector<1x2x32xf32>,
    %179 = vector.extract_strided_slice %9 {offsets = [6, 0, 0], sizes = [1, 2, 96], strides = [1, 1, 1]} : vector<8x2x96xf32> to vector<1x2x96xf32>
    %180 = vector.shape_cast %179 : vector<1x2x96xf32> to vector<2x96xf32>
    %cst_42 = arith.constant dense<0.000000e+00> : vector<2x96xf32>
    %181 = tpu.matmul %175, %0, %cst_42 {dimension_numbers = #tpu.dot_dimension_numbers<[1], [0], [0], [1], [0, 0, 1, 1], [], []>} : vector<2x32xf32>, vector<32x96xf32>, vector<2x96xf32> -> vector<2x96xf32>
    %182 = vector.broadcast %1 : vector<1x96xf32> to vector<2x96xf32>
    %183 = arith.addf %181, %182 : vector<2x96xf32>
    %184 = vector.extract_strided_slice %180 {offsets = [0, 0], sizes = [2, 64], strides = [1, 1]} : vector<2x96xf32> to vector<2x64xf32>
    %185 = vector.extract_strided_slice %183 {offsets = [0, 0], sizes = [2, 64], strides = [1, 1]} : vector<2x96xf32> to vector<2x64xf32>
    %186 = arith.addf %184, %185 : vector<2x64xf32>
    %187 = arith.negf %186 : vector<2x64xf32>
    %188 = math.exp %187 : vector<2x64xf32>
    %cst_43 = arith.constant 1.000000e+00 : f32
    %189 = vector.broadcast %cst_43 : f32 to vector<2x64xf32>
    %190 = arith.addf %189, %188 : vector<2x64xf32>
    %191 = arith.divf %189, %190 : vector<2x64xf32>
    %192 = vector.extract_strided_slice %191 {offsets = [0, 0], sizes = [2, 32], strides = [1, 1]} : vector<2x64xf32> to vector<2x32xf32>
    %193 = vector.extract_strided_slice %191 {offsets = [0, 32], sizes = [2, 32], strides = [1, 1]} : vector<2x64xf32> to vector<2x32xf32>
    %194 = vector.extract_strided_slice %180 {offsets = [0, 64], sizes = [2, 32], strides = [1, 1]} : vector<2x96xf32> to vector<2x32xf32>
    %195 = vector.extract_strided_slice %183 {offsets = [0, 64], sizes = [2, 32], strides = [1, 1]} : vector<2x96xf32> to vector<2x32xf32>
    %196 = arith.mulf %192, %195 : vector<2x32xf32>
    %197 = arith.addf %194, %196 : vector<2x32xf32>
    %198 = math.tanh %197 : vector<2x32xf32>
    %cst_44 = arith.constant 1.000000e+00 : f32
    %199 = vector.broadcast %cst_44 : f32 to vector<2x32xf32>
    %200 = arith.subf %199, %193 : vector<2x32xf32>
    %201 = arith.mulf %200, %198 : vector<2x32xf32>
    %202 = arith.mulf %193, %175 : vector<2x32xf32>
    %203 = arith.addf %201, %202 : vector<2x32xf32>
    %c6 = arith.constant 6 : index
    %c0_45 = arith.constant 0 : index
    %c0_46 = arith.constant 0 : index
    %204 = vector.load %arg8[%c6, %c0_45, %c0_46] : memref<8x2x32xf32, #tpu.memory_space<vmem>>, vector<1x2x32xf32>
    %205 = vector.shape_cast %204 : vector<1x2x32xf32> to vector<2x32xf32>
    %206 = vector.shape_cast %203 : vector<2x32xf32> to vector<1x2x32xf32>
    tpu.vector_store %arg8[%c6, %c0_45, %c0_46], %206 {strides = array<i32>} : memref<8x2x32xf32, #tpu.memory_space<vmem>>, vector<1x2x32xf32>,
    %207 = vector.extract_strided_slice %9 {offsets = [7, 0, 0], sizes = [1, 2, 96], strides = [1, 1, 1]} : vector<8x2x96xf32> to vector<1x2x96xf32>
    %208 = vector.shape_cast %207 : vector<1x2x96xf32> to vector<2x96xf32>
    %cst_47 = arith.constant dense<0.000000e+00> : vector<2x96xf32>
    %209 = tpu.matmul %203, %0, %cst_47 {dimension_numbers = #tpu.dot_dimension_numbers<[1], [0], [0], [1], [0, 0, 1, 1], [], []>} : vector<2x32xf32>, vector<32x96xf32>, vector<2x96xf32> -> vector<2x96xf32>
    %210 = vector.broadcast %1 : vector<1x96xf32> to vector<2x96xf32>
    %211 = arith.addf %209, %210 : vector<2x96xf32>
    %212 = vector.extract_strided_slice %208 {offsets = [0, 0], sizes = [2, 64], strides = [1, 1]} : vector<2x96xf32> to vector<2x64xf32>
    %213 = vector.extract_strided_slice %211 {offsets = [0, 0], sizes = [2, 64], strides = [1, 1]} : vector<2x96xf32> to vector<2x64xf32>
    %214 = arith.addf %212, %213 : vector<2x64xf32>
    %215 = arith.negf %214 : vector<2x64xf32>
    %216 = math.exp %215 : vector<2x64xf32>
    %cst_48 = arith.constant 1.000000e+00 : f32
    %217 = vector.broadcast %cst_48 : f32 to vector<2x64xf32>
    %218 = arith.addf %217, %216 : vector<2x64xf32>
    %219 = arith.divf %217, %218 : vector<2x64xf32>
    %220 = vector.extract_strided_slice %219 {offsets = [0, 0], sizes = [2, 32], strides = [1, 1]} : vector<2x64xf32> to vector<2x32xf32>
    %221 = vector.extract_strided_slice %219 {offsets = [0, 32], sizes = [2, 32], strides = [1, 1]} : vector<2x64xf32> to vector<2x32xf32>
    %222 = vector.extract_strided_slice %208 {offsets = [0, 64], sizes = [2, 32], strides = [1, 1]} : vector<2x96xf32> to vector<2x32xf32>
    %223 = vector.extract_strided_slice %211 {offsets = [0, 64], sizes = [2, 32], strides = [1, 1]} : vector<2x96xf32> to vector<2x32xf32>
    %224 = arith.mulf %220, %223 : vector<2x32xf32>
    %225 = arith.addf %222, %224 : vector<2x32xf32>
    %226 = math.tanh %225 : vector<2x32xf32>
    %cst_49 = arith.constant 1.000000e+00 : f32
    %227 = vector.broadcast %cst_49 : f32 to vector<2x32xf32>
    %228 = arith.subf %227, %221 : vector<2x32xf32>
    %229 = arith.mulf %228, %226 : vector<2x32xf32>
    %230 = arith.mulf %221, %203 : vector<2x32xf32>
    %231 = arith.addf %229, %230 : vector<2x32xf32>
    %c7 = arith.constant 7 : index
    %c0_50 = arith.constant 0 : index
    %c0_51 = arith.constant 0 : index
    %232 = vector.load %arg8[%c7, %c0_50, %c0_51] : memref<8x2x32xf32, #tpu.memory_space<vmem>>, vector<1x2x32xf32>
    %233 = vector.shape_cast %232 : vector<1x2x32xf32> to vector<2x32xf32>
    %234 = vector.shape_cast %231 : vector<2x32xf32> to vector<1x2x32xf32>
    tpu.vector_store %arg8[%c7, %c0_50, %c0_51], %234 {strides = array<i32>} : memref<8x2x32xf32, #tpu.memory_space<vmem>>, vector<1x2x32xf32>,
    %c0_52 = arith.constant 0 : index
    %c0_53 = arith.constant 0 : index
    %c0_54 = arith.constant 0 : index
    %235 = vector.load %arg8[%c0_52, %c0_53, %c0_54] : memref<8x2x32xf32, #tpu.memory_space<vmem>>, vector<8x2x32xf32>
    %c0_55 = arith.constant 0 : index
    %c0_56 = arith.constant 0 : index
    %236 = vector.load %arg5[%c0_55, %c0_56] : memref<1x32xf32, #tpu.memory_space<vmem>>, vector<1x32xf32>
    %237 = vector.shape_cast %236 : vector<1x32xf32> to vector<1x1x32xf32>
    %238 = vector.broadcast %237 : vector<1x1x32xf32> to vector<8x2x32xf32>
    %239 = arith.mulf %235, %238 : vector<8x2x32xf32>
    %cst_57 = arith.constant dense<0.000000e+00> : vector<8x2xf32>
    %240 = vector.multi_reduction <add>, %239, %cst_57 [2] : vector<8x2x32xf32> to vector<8x2xf32>
    %c0_58 = arith.constant 0 : index
    %c0_59 = arith.constant 0 : index
    %241 = vector.load %arg6[%c0_58, %c0_59] : memref<1x1xf32, #tpu.memory_space<vmem>>, vector<1x1xf32>
    %242 = vector.broadcast %241 : vector<1x1xf32> to vector<8x2xf32>
    %243 = arith.addf %240, %242 : vector<8x2xf32>
    %c0_60 = arith.constant 0 : index
    %c0_61 = arith.constant 0 : index
    %244 = vector.load %arg7[%c0_60, %c0_61] : memref<8x2xf32, #tpu.memory_space<vmem>>, vector<8x2xf32>
    tpu.vector_store %arg7[%c0_60, %c0_61], %243 {strides = array<i32>} : memref<8x2xf32, #tpu.memory_space<vmem>>, vector<8x2xf32>,
    return
  }
}

</mosaic_0001>

<bundles_post_ra>
// kernel: tpu_custom_call.1
= control target key start
LH: loop header
LB: loop body
LE: loop exit
PB: predicated region body
PF: predicated region fallthrough
CT: control target
= control target key end

     0   :  { %s1846_s0 = inlined_call_operand.vmem [shape: f32[8,2,7], index: 0, kind: input, shape index: {}]   ;;  %s1847_s1 = inlined_call_operand.hbm [shape: f32[7,96], index: 1, kind: input, shape index: {}]   ;;  %s1848_s2 = inlined_call_operand.vmem [shape: f32[32,96], index: 2, kind: input, shape index: {}]   ;;  %s1849_s3 = inlined_call_operand.vmem [shape: f32[1,96], index: 3, kind: input, shape index: {}]   ;;  %s1850_s4 = inlined_call_operand.vmem [shape: f32[1,96], index: 4, kind: input, shape index: {}]   ;;  %s1851_s5 = inlined_call_operand.vmem [shape: f32[1,32], index: 5, kind: input, shape index: {}]   ;;  %s1852_s6 = inlined_call_operand.<no memory space> [shape: f32[1,1], index: 6, kind: input, shape index: {}]   ;;  %s1853_s7 = inlined_call_operand.vmem [shape: f32[8,2], index: 7, kind: output, shape index: {}]  }
   0x1   :  { %v12_v0 = vstv %s1852_s6 }
   0x2   :  { %13 = vst [vmem:[#allocation3] sm:$0x1] %v12_v0 }
   0x3   :  { %14 = vsyncpa [#allocation5], 0  ;;  %s1549_s26 = smov [#allocation4]  }
   0x4   :  { %s23_s27 = sshll.u32 %s1549_s26, 4  ;;  %s24_s27 = int_to_ptr.vmem [resolvable:$true] %s23_s27 }
   0x5   :  { %s1535_s28 = scalar_lea.vmem %s24_s27, 128  ;;  %p1540_p1 = scmp.lt.s32.totalorder %s24_s27, %s24_s27 }
   0x6   :  { %p1536_p0 = scmp.ne.s32.totalorder %s24_s27, %s1535_s28  ;;  %p1541_p2 = scmp.lt.s32.totalorder %s1535_s28, %s1535_s28 }
   0x8   :  { %p1542_p3 = por %p1541_p2, %p1540_p1 }
   0xa   :  { %p1543_p4 = pnand %p1542_p3, %p1536_p0 }
   0xc   :  { %1546 = shalt.err (!%p1543_p4)
}
   0xd   :  { %26 = dma.hbm_to_vmem [thread:$0]  %s1847_s1, 128, %s24_s27, [#allocation5]  }
   0xe   :  { %1547 = dma.done.wait [#allocation5], 128  }
   0xf   :  { %1548 = vsyncadd [#allocation5], 4294967168  ;;  %v74_v1 = vlaneseq  ;;  %v1550_v2 = vmov 0.0   ;;  %v1551_v3 = vmov 1983009808   ;;  %vm1552_vm0 = vmmov 0  }
  0x10   :  { %1382 = vmatprep.subr.mxu1 %v1550_v2  ;;  %v72_v4 = vunpack.c.l.s4 %v1551_v3  ;;  %1390 = vmatprep.mubr.msk.f32.mxu1 %vm1552_vm0, %v1550_v2  ;;  %vm108_vm1 = vcmask 1046528   ;;  %v1611_v7 = vld [vmem:[%s1848_s2 + $0x18] sm:$0xff]  ;;  %v1616_v8 = vld [vmem:[%s1848_s2 + $0x10] sm:$0xff]  ;;  %v45_v11 = vld [vmem:[%s1846_s0] sm:$0x3]  ;;  %vm103_vm2 = vcmask 56320  }
  0x11   :  { %v1606_v6 = vshrl.u32 %v74_v1, 7  ;;  %1383 = vmatpush3.msra.mxu1 %v1611_v7  ;;  %v53_v10 = vld [vmem:[#allocation4] sm:$0x7f]  ;;  %v46_v12 = vld [vmem:[%s1846_s0 + $0x2] sm:$0x3]  ;;  %v1632_v13 = vld [vmem:[%s1848_s2 + $0x8] sm:$0xff] }
  0x12   :  { %v73_v5 = vunpack.c.0.s8 %v72_v4  ;;  %1384 = vmatprep.subr.mxu1 %v1550_v2  ;;  %1377 = vmatprep.subr.msk.mxu0 %vm108_vm1, %v53_v10  ;;  %v47_v14 = vld [vmem:[%s1846_s0 + $0x4] sm:$0x3]  ;;  %v48_v15 = vld [vmem:[%s1846_s0 + $0x6] sm:$0x3]  ;;  %v69_v16 = vcombine.low %v45_v11, %v46_v12  ;;  %v49_v18 = vld [vmem:[%s1846_s0 + $0x8] sm:$0x3] }
  0x13   :  { %1385 = vmatpush3.msra.mxu1 %v1616_v8  ;;  %1378 = vmatpush3.msk.msra.mxu0 %vm108_vm1, %v53_v10  ;;  %v70_v17 = vcombine.low %v47_v14, %v48_v15  ;;  %v50_v19 = vld [vmem:[%s1846_s0 + $0xa] sm:$0x3]  ;;  %v51_v20 = vld [vmem:[%s1846_s0 + $0xc] sm:$0x3]  ;;  %v1655_v22 = vld [vmem:[%s1848_s2] sm:$0xff]  ;;  %s1553_s8 = smov 64  }
  0x14   :  { %v1619_v9 = vsub.s32 %v73_v5, %v1606_v6  ;;  %1386 = vmatprep.subr.mxu1 %v1550_v2  ;;  %v52_v23 = vld [vmem:[%s1846_s0 + $0xe] sm:$0x3]  ;;  %v86_v24 = vcombine.low %v49_v18, %v50_v19  ;;  %1393 = vmatprep.subr.mxu0 %v1550_v2  ;;  %v1692_v31 = vld [vmem:[%s1850_s4] ss:$0 sm:$0xff]  ;;  %vm355_vm3 = vcmask 254976   ;;  %vm237_vm4 = vcmask 261120  }
  0x15   :  { %1387 = vmatpush3.msra.mxu1 %v1632_v13  ;;  %v87_v26 = vcombine.low %v51_v20, %v52_v23  ;;  %v1312_v36 = vld [vmem:[%s1849_s3] ss:$0 sm:$0xff]  ;;  %s1554_s3 = smov 96   ;;  %vm1290_vm5 = vcmask 1041409   ;;  %vm1292_vm6 = vcmask 1042434   ;;  %vm1294_vm7 = vcmask 1043459  }
  0x16   :  { %v77_v21 = vrot.slane %v69_v16, %v1619_v9  ;;  %v84_v25 = vrot.slane %v70_v17, %v1619_v9  ;;  %1388 = vmatprep.subr.mxu1 %v1550_v2  ;;  %v94_v27 = vrot.slane %v86_v24, %v1619_v9  ;;  %vm1296_vm8 = vcmask 1044484  }
  0x17   :  { %1389 = vmatpush3.msra.mxu1 %v1655_v22  ;;  %v101_v29 = vrot.slane %v87_v26, %v1619_v9  ;;  %vm1298_vm9 = vcmask 1045509   ;;  %vm1300_vm10 = vcmask 1046534   ;;  %vm1302_vm11 = vcmask 1047559  }
  0x18   :  { %v85_v28 = vcombine.low %v77_v21, %v84_v25  ;;  %1391 = vmatmul.mubr.f32.vlgmr.msra.gmra.mxu1 %v1550_v2  ;;  %1404 = vmatprep.subr.mxu1 %v1550_v2  ;;  %vm1305_vm12 = vcmask 15360  }
  0x19   :  { %v102_v30 = vcombine.low %v94_v27, %v101_v29  ;;  %1405 = vmatpush3.msra.mxu1 %v1611_v7  ;;  %1412 = vmatprep.mubr.msk.f32.mxu1 %vm1552_vm0, %v1550_v2 }
  0x1a   :  { %1379 = vmatprep.mubr.msk.f32.mxu0 %vm103_vm2, %v85_v28  ;;  %1406 = vmatprep.subr.mxu1 %v1550_v2 }
  0x1b   :  { %1380 = vmatmul.mubr.msk.f32.vlgmr.msra.gmra.mxu0 %vm103_vm2, %v102_v30  ;;  %1407 = vmatpush3.msra.mxu1 %v1616_v8 }
  0x1c   :  { %1394 = vmatpush3.msra.mxu0 %v1611_v7  ;;  %1401 = vmatprep.mubr.msk.f32.mxu0 %vm1552_vm0, %v1550_v2 }
  0x1d   :  { %1395 = vmatprep.subr.mxu0 %v1550_v2  ;;  %1408 = vmatprep.subr.mxu1 %v1550_v2 }
  0x1e   :  { %1396 = vmatpush3.msra.mxu0 %v1616_v8  ;;  %1409 = vmatpush3.msra.mxu1 %v1632_v13 }
  0x1f   :  { %1397 = vmatprep.subr.mxu0 %v1550_v2  ;;  %1410 = vmatprep.subr.mxu1 %v1550_v2 }
  0x20   :  { %1398 = vmatpush3.msra.mxu0 %v1632_v13  ;;  %1411 = vmatpush3.msra.mxu1 %v1655_v22 }
  0x21   :  { %1399 = vmatprep.subr.mxu0 %v1550_v2  ;;  %1426 = vmatprep.subr.mxu1 %v1550_v2 }
  0x22   :  { %1400 = vmatpush3.msra.mxu0 %v1655_v22 }
  0x23   :  { %1415 = vmatprep.subr.mxu0 %v1550_v2 }
  0xd8   :  { %v307_v32 = vpop.f32.mrf.mxu1 }
  0xd9   :  { %v308_v33 = vadd.f32 %v1692_v31, %v307_v32 }
  0xda   :  { %v1392_v34 = vpop.f32.mrf.mxu1 }
  0xdb   :  { %v1381_v35 = vpop.f32.mrf.mxu0  ;;  %v325_v37 = vrot.slane %v308_v33, %v1619_v9 }
  0xdc   :  { %v1699_v38 = vadd.f32 %v1381_v35, %v1312_v36 }
  0xdd   :  { %326 = vrot.lane.b32.xlu0 %v325_v37, %s1553_s8  ;;  %v178_v39 = vpop.f32.mrf.mxu0 }
  0xde   :  { %v1702_v40 = vadd.f32 %v1312_v36, %v178_v39 }
  0xe0   :  { %v196_v41 = vrot.slane %v1702_v40, %v1619_v9  ;;  %v189_v29 = vcombine.high %v1702_v40, %v1702_v40 }
  0xe2   :  { %v311_v42 = vadd.f32 %v308_v33, %v196_v41  ;;  %v204_v63 = vcombine.high %v196_v41, %v196_v41  ;;  %v203_v30 = vrot.slane %v189_v29, %v1619_v9 }
  0xe4   :  { %v1317_v43 = vmul.f32 -1.442695, %v311_v42 }
  0xe6   :  { %1479 = vpow2.f32 %v1317_v43 }
  0xf3   :  { %v1480_v44 = vpop.eup %1479 }
  0xf4   :  { %v315_v45 = vadd.f32 1.0, %v1480_v44 }
  0xf6   :  { %1481 = vrcp.f32 %v315_v45 }
 0x103   :  { %v1482_v46 = vpop.eup %1481 }
 0x104   :  { %v336_v52 = vsub.f32 1.0, %v1482_v46  ;;  %v342_v54 = vmul.f32 0.0, %v1482_v46 }
 0x14f   :  { %v327_v47 = vpop.permute.xlu0 %326 }
 0x150   :  { %v329_v48 = vmul.f32 %v1482_v46, %v327_v47 }
 0x152   :  { %331 = vrot.lane.b32.xlu0 %v329_v48, %s1553_s8 }
 0x1c4   :  { %v332_v49 = vpop.permute.xlu0 %331 }
 0x1c5   :  { %v334_v50 = vadd.f32 %v332_v49, %v196_v41 }
 0x1c7   :  { %1483 = vtanh.f32 %v334_v50 }
 0x1d4   :  { %v1484_v51 = vpop.eup %1483 }
 0x1d5   :  { %338 = vrot.lane.b32.xlu1 %v1484_v51, %s1554_s3 }
 0x247   :  { %v339_v53 = vpop.permute.xlu1 %338 }
 0x248   :  { %v341_v55 = vmul.f32 %v339_v53, %v336_v52 }
 0x24a   :  { %v343_v56 = vadd.f32 %v342_v54, %v341_v55  ;;  %v205_v54 = vcombine.high %v203_v30, %v203_v30 }
 0x24c   :  { %v351_v57 = vrot.slane %v343_v56, %v1619_v9 }
 0x24e   :  { %352 = vrot.lane.b32.xlu1 %v351_v57, %s1554_s3 }
 0x2c0   :  { %v353_v58 = vpop.permute.xlu1 %352 }
 0x2c1   :  { %356 = vst.msk [vmem:[#allocation2] sm:$0x3] %vm355_vm3, %v353_v58  ;;  %1402 = vmatmul.mubr.msk.f32.vlgmr.msra.gmra.mxu0 %vm237_vm4, %v353_v58 }
 0x2c2   :  { %1416 = vmatpush3.msra.mxu0 %v1611_v7  ;;  %1423 = vmatprep.mubr.msk.f32.mxu0 %vm1552_vm0, %v1550_v2 }
 0x2c3   :  { %1417 = vmatprep.subr.mxu0 %v1550_v2 }
 0x2c4   :  { %1418 = vmatpush3.msra.mxu0 %v1616_v8 }
 0x2c5   :  { %1419 = vmatprep.subr.mxu0 %v1550_v2 }
 0x2c6   :  { %1420 = vmatpush3.msra.mxu0 %v1632_v13 }
 0x2c7   :  { %1421 = vmatprep.subr.mxu0 %v1550_v2 }
 0x2c8   :  { %1422 = vmatpush3.msra.mxu0 %v1655_v22 }
 0x2c9   :  { %1437 = vmatprep.subr.mxu0 %v1550_v2 }
 0x381   :  { %v425_v59 = vpop.f32.mrf.mxu0 }
 0x382   :  { %v426_v60 = vadd.f32 %v1692_v31, %v425_v59 }
 0x383   :  { %v1403_v61 = vpop.f32.mrf.mxu0 }
 0x384   :  { %v443_v62 = vrot.slane %v426_v60, %v1619_v9  ;;  %v429_v0 = vadd.f32 %v426_v60, %v204_v63 }
 0x386   :  { %444 = vrot.lane.b32.xlu0 %v443_v62, %s1553_s8  ;;  %v1319_v3 = vmul.f32 -1.442695, %v429_v0 }
 0x388   :  { %1485 = vpow2.f32 %v1319_v3 }
 0x395   :  { %v1486_v4 = vpop.eup %1485 }
 0x396   :  { %v433_v5 = vadd.f32 1.0, %v1486_v4 }
 0x398   :  { %1487 = vrcp.f32 %v433_v5 }
 0x3a5   :  { %v1488_v10 = vpop.eup %1487 }
 0x3a6   :  { %v454_v17 = vsub.f32 1.0, %v1488_v10  ;;  %v460_v19 = vmul.f32 %v1488_v10, %v343_v56 }
 0x3f8   :  { %v445_v11 = vpop.permute.xlu0 %444 }
 0x3f9   :  { %v447_v12 = vmul.f32 %v1488_v10, %v445_v11 }
 0x3fb   :  { %449 = vrot.lane.b32.xlu1 %v447_v12, %s1553_s8 }
 0x46d   :  { %v450_v14 = vpop.permute.xlu1 %449 }
 0x46e   :  { %v452_v15 = vadd.f32 %v450_v14, %v204_v63 }
 0x470   :  { %1489 = vtanh.f32 %v452_v15 }
 0x47d   :  { %v1490_v16 = vpop.eup %1489 }
 0x47e   :  { %456 = vrot.lane.b32.xlu0 %v1490_v16, %s1554_s3 }
 0x4f0   :  { %v457_v18 = vpop.permute.xlu0 %456 }
 0x4f1   :  { %v459_v20 = vmul.f32 %v457_v18, %v454_v17 }
 0x4f3   :  { %v461_v21 = vadd.f32 %v460_v19, %v459_v20  ;;  %v213_v19 = vrot.slane %v1699_v38, %v1619_v9 }
 0x4f5   :  { %v469_v23 = vrot.slane %v461_v21, %v1619_v9 }
 0x4f7   :  { %470 = vrot.lane.b32.xlu1 %v469_v23, %s1554_s3 }
 0x569   :  { %v471_v24 = vpop.permute.xlu1 %470 }
 0x56a   :  { %474 = vst.msk [vmem:[#allocation2 + $0x2] sm:$0x3] %vm355_vm3, %v471_v24  ;;  %1413 = vmatmul.mubr.msk.f32.vlgmr.msra.gmra.mxu1 %vm237_vm4, %v471_v24 }
 0x56b   :  { %1427 = vmatpush3.msra.mxu1 %v1611_v7  ;;  %1434 = vmatprep.mubr.msk.f32.mxu1 %vm1552_vm0, %v1550_v2 }
 0x56c   :  { %1428 = vmatprep.subr.mxu1 %v1550_v2 }
 0x56d   :  { %1429 = vmatpush3.msra.mxu1 %v1616_v8 }
 0x56e   :  { %1430 = vmatprep.subr.mxu1 %v1550_v2 }
 0x56f   :  { %1431 = vmatpush3.msra.mxu1 %v1632_v13 }
 0x570   :  { %1432 = vmatprep.subr.mxu1 %v1550_v2 }
 0x571   :  { %1433 = vmatpush3.msra.mxu1 %v1655_v22 }
 0x572   :  { %1448 = vmatprep.subr.mxu1 %v1550_v2 }
 0x62a   :  { %v543_v25 = vpop.f32.mrf.mxu1 }
 0x62b   :  { %v544_v26 = vadd.f32 %v1692_v31, %v543_v25 }
 0x62c   :  { %v1414_v27 = vpop.f32.mrf.mxu1 }
 0x62d   :  { %v561_v28 = vrot.slane %v544_v26, %v1619_v9  ;;  %v547_v32 = vadd.f32 %v544_v26, %v203_v30 }
 0x62f   :  { %562 = vrot.lane.b32.xlu0 %v561_v28, %s1553_s8  ;;  %v1321_v33 = vmul.f32 -1.442695, %v547_v32 }
 0x631   :  { %1491 = vpow2.f32 %v1321_v33 }
 0x63e   :  { %v1492_v34 = vpop.eup %1491 }
 0x63f   :  { %v551_v35 = vadd.f32 1.0, %v1492_v34 }
 0x641   :  { %1493 = vrcp.f32 %v551_v35 }
 0x64e   :  { %v1494_v36 = vpop.eup %1493 }
 0x64f   :  { %v572_v40 = vsub.f32 1.0, %v1494_v36  ;;  %v578_v45 = vmul.f32 %v1494_v36, %v461_v21 }
 0x6a1   :  { %v563_v37 = vpop.permute.xlu0 %562 }
 0x6a2   :  { %v565_v39 = vmul.f32 %v1494_v36, %v563_v37 }
 0x6a4   :  { %567 = vrot.lane.b32.xlu1 %v565_v39, %s1553_s8 }
 0x716   :  { %v568_v41 = vpop.permute.xlu1 %567 }
 0x717   :  { %v570_v42 = vadd.f32 %v568_v41, %v203_v30 }
 0x719   :  { %1495 = vtanh.f32 %v570_v42 }
 0x726   :  { %v1496_v43 = vpop.eup %1495 }
 0x727   :  { %574 = vrot.lane.b32.xlu0 %v1496_v43, %s1554_s3 }
 0x799   :  { %v575_v44 = vpop.permute.xlu0 %574 }
 0x79a   :  { %v577_v46 = vmul.f32 %v575_v44, %v572_v40  ;;  %v221_v40 = vcombine.high %v213_v19, %v213_v19 }
 0x79c   :  { %v579_v47 = vadd.f32 %v578_v45, %v577_v46 }
 0x79e   :  { %v587_v48 = vrot.slane %v579_v47, %v1619_v9 }
 0x7a0   :  { %588 = vrot.lane.b32.xlu1 %v587_v48, %s1554_s3 }
 0x812   :  { %v589_v49 = vpop.permute.xlu1 %588 }
 0x813   :  { %592 = vst.msk [vmem:[#allocation2 + $0x4] sm:$0x3] %vm355_vm3, %v589_v49  ;;  %1424 = vmatmul.mubr.msk.f32.vlgmr.msra.gmra.mxu0 %vm237_vm4, %v589_v49 }
 0x814   :  { %1438 = vmatpush3.msra.mxu0 %v1611_v7  ;;  %1445 = vmatprep.mubr.msk.f32.mxu0 %vm1552_vm0, %v1550_v2 }
 0x815   :  { %1439 = vmatprep.subr.mxu0 %v1550_v2 }
 0x816   :  { %1440 = vmatpush3.msra.mxu0 %v1616_v8 }
 0x817   :  { %1441 = vmatprep.subr.mxu0 %v1550_v2 }
 0x818   :  { %1442 = vmatpush3.msra.mxu0 %v1632_v13 }
 0x819   :  { %1443 = vmatprep.subr.mxu0 %v1550_v2 }
 0x81a   :  { %1444 = vmatpush3.msra.mxu0 %v1655_v22 }
 0x81b   :  { %1459 = vmatprep.subr.mxu0 %v1550_v2 }
 0x8d3   :  { %v661_v50 = vpop.f32.mrf.mxu0 }
 0x8d4   :  { %v662_v51 = vadd.f32 %v1692_v31, %v661_v50 }
 0x8d5   :  { %v1425_v52 = vpop.f32.mrf.mxu0 }
 0x8d6   :  { %v679_v53 = vrot.slane %v662_v51, %v1619_v9  ;;  %v665_v55 = vadd.f32 %v662_v51, %v205_v54 }
 0x8d8   :  { %680 = vrot.lane.b32.xlu0 %v679_v53, %s1553_s8  ;;  %v1323_v56 = vmul.f32 -1.442695, %v665_v55 }
 0x8da   :  { %1497 = vpow2.f32 %v1323_v56 }
 0x8e7   :  { %v1498_v57 = vpop.eup %1497 }
 0x8e8   :  { %v669_v58 = vadd.f32 1.0, %v1498_v57 }
 0x8ea   :  { %1499 = vrcp.f32 %v669_v58 }
 0x8f7   :  { %v1500_v59 = vpop.eup %1499 }
 0x8f8   :  { %v690_v3 = vsub.f32 1.0, %v1500_v59  ;;  %v696_v5 = vmul.f32 %v1500_v59, %v579_v47 }
 0x94a   :  { %v681_v60 = vpop.permute.xlu0 %680 }
 0x94b   :  { %v683_v61 = vmul.f32 %v1500_v59, %v681_v60 }
 0x94d   :  { %685 = vrot.lane.b32.xlu1 %v683_v61, %s1553_s8  ;;  %v206_v61 = vcombine.high %v1699_v38, %v1699_v38 }
 0x9bf   :  { %v686_v62 = vpop.permute.xlu1 %685 }
 0x9c0   :  { %v688_v63 = vadd.f32 %v686_v62, %v205_v54  ;;  %v220_v62 = vrot.slane %v206_v61, %v1619_v9 }
 0x9c2   :  { %1501 = vtanh.f32 %v688_v63 }
 0x9cf   :  { %v1502_v0 = vpop.eup %1501 }
 0x9d0   :  { %692 = vrot.lane.b32.xlu0 %v1502_v0, %s1554_s3 }
 0xa42   :  { %v693_v4 = vpop.permute.xlu0 %692 }
 0xa43   :  { %v695_v10 = vmul.f32 %v693_v4, %v690_v3 }
 0xa45   :  { %v697_v11 = vadd.f32 %v696_v5, %v695_v10 }
 0xa47   :  { %v705_v12 = vrot.slane %v697_v11, %v1619_v9 }
 0xa49   :  { %706 = vrot.lane.b32.xlu1 %v705_v12, %s1554_s3 }
 0xabb   :  { %v707_v14 = vpop.permute.xlu1 %706 }
 0xabc   :  { %710 = vst.msk [vmem:[#allocation2 + $0x6] sm:$0x3] %vm355_vm3, %v707_v14  ;;  %1435 = vmatmul.mubr.msk.f32.vlgmr.msra.gmra.mxu1 %vm237_vm4, %v707_v14 }
 0xabd   :  { %1449 = vmatpush3.msra.mxu1 %v1611_v7  ;;  %1456 = vmatprep.mubr.msk.f32.mxu1 %vm1552_vm0, %v1550_v2 }
 0xabe   :  { %1450 = vmatprep.subr.mxu1 %v1550_v2 }
 0xabf   :  { %1451 = vmatpush3.msra.mxu1 %v1616_v8 }
 0xac0   :  { %1452 = vmatprep.subr.mxu1 %v1550_v2 }
 0xac1   :  { %1453 = vmatpush3.msra.mxu1 %v1632_v13 }
 0xac2   :  { %1454 = vmatprep.subr.mxu1 %v1550_v2 }
 0xac3   :  { %1455 = vmatpush3.msra.mxu1 %v1655_v22 }
 0xb7c   :  { %v779_v15 = vpop.f32.mrf.mxu1 }
 0xb7d   :  { %v780_v16 = vadd.f32 %v1692_v31, %v779_v15 }
 0xb7e   :  { %v1436_v17 = vpop.f32.mrf.mxu1 }
 0xb7f   :  { %v797_v18 = vrot.slane %v780_v16, %v1619_v9  ;;  %v783_v20 = vadd.f32 %v780_v16, %v213_v19 }
 0xb81   :  { %798 = vrot.lane.b32.xlu0 %v797_v18, %s1553_s8  ;;  %v1325_v21 = vmul.f32 -1.442695, %v783_v20 }
 0xb83   :  { %1503 = vpow2.f32 %v1325_v21 }
 0xb90   :  { %v1504_v23 = vpop.eup %1503 }
 0xb91   :  { %v787_v24 = vadd.f32 1.0, %v1504_v23 }
 0xb93   :  { %1505 = vrcp.f32 %v787_v24 }
 0xba0   :  { %v1506_v25 = vpop.eup %1505 }
 0xba1   :  { %v808_v32 = vsub.f32 1.0, %v1506_v25  ;;  %v814_v34 = vmul.f32 %v1506_v25, %v697_v11 }
 0xbf3   :  { %v799_v26 = vpop.permute.xlu0 %798 }
 0xbf4   :  { %v801_v27 = vmul.f32 %v1506_v25, %v799_v26 }
 0xbf6   :  { %803 = vrot.lane.b32.xlu1 %v801_v27, %s1553_s8  ;;  %v222_v27 = vcombine.high %v220_v62, %v220_v62 }
 0xc68   :  { %v804_v28 = vpop.permute.xlu1 %803 }
 0xc69   :  { %v806_v29 = vadd.f32 %v804_v28, %v213_v19 }
 0xc6b   :  { %1507 = vtanh.f32 %v806_v29 }
 0xc78   :  { %v1508_v30 = vpop.eup %1507 }
 0xc79   :  { %810 = vrot.lane.b32.xlu0 %v1508_v30, %s1554_s3 }
 0xceb   :  { %v811_v33 = vpop.permute.xlu0 %810 }
 0xcec   :  { %v813_v35 = vmul.f32 %v811_v33, %v808_v32 }
 0xcee   :  { %v815_v36 = vadd.f32 %v814_v34, %v813_v35 }
 0xcf0   :  { %v823_v37 = vrot.slane %v815_v36, %v1619_v9 }
 0xcf2   :  { %824 = vrot.lane.b32.xlu1 %v823_v37, %s1554_s3 }
 0xd64   :  { %v825_v39 = vpop.permute.xlu1 %824 }
 0xd65   :  { %828 = vst.msk [vmem:[#allocation2 + $0x8] sm:$0x3] %vm355_vm3, %v825_v39  ;;  %1446 = vmatmul.mubr.msk.f32.vlgmr.msra.gmra.mxu0 %vm237_vm4, %v825_v39  ;;  %v1183_v39 = vld [vmem:[#allocation2] sm:$0x3] }
 0xd66   :  { %1460 = vmatpush3.msra.mxu0 %v1611_v7  ;;  %1467 = vmatprep.mubr.msk.f32.mxu0 %vm1552_vm0, %v1550_v2 }
 0xd67   :  { %1461 = vmatprep.subr.mxu0 %v1550_v2 }
 0xd68   :  { %1462 = vmatpush3.msra.mxu0 %v1616_v8 }
 0xd69   :  { %1463 = vmatprep.subr.mxu0 %v1550_v2 }
 0xd6a   :  { %1464 = vmatpush3.msra.mxu0 %v1632_v13 }
 0xd6b   :  { %1465 = vmatprep.subr.mxu0 %v1550_v2 }
 0xd6c   :  { %1466 = vmatpush3.msra.mxu0 %v1655_v22 }
 0xe25   :  { %v897_v41 = vpop.f32.mrf.mxu0 }
 0xe26   :  { %v898_v42 = vadd.f32 %v1692_v31, %v897_v41  ;;  %v1332_v41 = vld [vmem:[%s1851_s5] ss:$0 sm:$0xff] }
 0xe27   :  { %v1447_v43 = vpop.f32.mrf.mxu0 }
 0xe28   :  { %v915_v7 = vrot.slane %v898_v42, %v1619_v9  ;;  %v901_v44 = vadd.f32 %v898_v42, %v221_v40  ;;  %v1198_v42 = vmul.f32 %v1332_v41, %v1183_v39  ;;  %v1185_v43 = vld [vmem:[#allocation2 + $0x4] sm:$0x3] }
 0xe2a   :  { %916 = vrot.lane.b32.xlu0 %v915_v7, %s1553_s8  ;;  %v1327_v45 = vmul.f32 -1.442695, %v901_v44  ;;  %v1206_v7 = vsel %vm355_vm3, %v1198_v42, 0.0  ;;  %v1186_v44 = vld [vmem:[#allocation2 + $0x6] sm:$0x3] }
 0xe2c   :  { %1509 = vpow2.f32 %v1327_v45 }
 0xe39   :  { %v1510_v8 = vpop.eup %1509 }
 0xe3a   :  { %v905_v46 = vadd.f32 1.0, %v1510_v8  ;;  %v1201_v8 = vmul.f32 %v1332_v41, %v1186_v44 }
 0xe3c   :  { %1511 = vrcp.f32 %v905_v46 }
 0xe49   :  { %v1512_v13 = vpop.eup %1511 }
 0xe4a   :  { %v926_v50 = vsub.f32 1.0, %v1512_v13  ;;  %v932_v52 = vmul.f32 %v1512_v13, %v815_v36 }
 0xe9c   :  { %v917_v47 = vpop.permute.xlu0 %916 }
 0xe9d   :  { %v919_v2 = vmul.f32 %v1512_v13, %v917_v47  ;;  %v1215_v13 = vsel %vm355_vm3, %v1201_v8, 0.0 }
 0xe9f   :  { %921 = vrot.lane.b32.xlu1 %v919_v2, %s1553_s8 }
 0xf11   :  { %v922_v22 = vpop.permute.xlu1 %921 }
 0xf12   :  { %v924_v48 = vadd.f32 %v922_v22, %v221_v40  ;;  %v1200_v40 = vmul.f32 %v1332_v41, %v1185_v43  ;;  %v1555_v22 = vmov 0  }
 0xf13   :  { %1477 = vset.pattern.permute.xlu1 %v1555_v22  ;;  %1478 = vset.pattern.permute.xlu0 %v1555_v22 }
 0xf14   :  { %1513 = vtanh.f32 %v924_v48  ;;  %v1212_v45 = vsel %vm355_vm3, %v1200_v40, 0.0 }
 0xf21   :  { %v1514_v49 = vpop.eup %1513 }
 0xf22   :  { %928 = vrot.lane.b32.xlu0 %v1514_v49, %s1554_s3 }
 0xf94   :  { %v929_v51 = vpop.permute.xlu0 %928 }
 0xf95   :  { %v931_v53 = vmul.f32 %v929_v51, %v926_v50 }
 0xf97   :  { %v933_v54 = vadd.f32 %v932_v52, %v931_v53 }
 0xf99   :  { %v941_v55 = vrot.slane %v933_v54, %v1619_v9 }
 0xf9b   :  { %942 = vrot.lane.b32.xlu1 %v941_v55, %s1554_s3 }
0x100d   :  { %v943_v56 = vpop.permute.xlu1 %942 }
0x100e   :  { %946 = vst.msk [vmem:[#allocation2 + $0xa] sm:$0x3] %vm355_vm3, %v943_v56  ;;  %1457 = vmatmul.mubr.msk.f32.vlgmr.msra.gmra.mxu1 %vm237_vm4, %v943_v56  ;;  %v1187_v56 = vld [vmem:[#allocation2 + $0x8] sm:$0x3] }
0x1015   :  { %v1188_v46 = vld [vmem:[#allocation2 + $0xa] sm:$0x3] }
0x1016   :  { %v1203_v47 = vmul.f32 %v1332_v41, %v1188_v46 }
0x1018   :  { %v1221_v2 = vsel %vm355_vm3, %v1203_v47, 0.0 }
0x10ce   :  { %v1015_v57 = vpop.f32.mrf.mxu1 }
0x10cf   :  { %v1016_v58 = vadd.f32 %v1692_v31, %v1015_v57 }
0x10d0   :  { %v1458_v59 = vpop.f32.mrf.mxu1 }
0x10d1   :  { %v1033_v60 = vrot.slane %v1016_v58, %v1619_v9  ;;  %v1019_v63 = vadd.f32 %v1016_v58, %v220_v62  ;;  %v1202_v58 = vmul.f32 %v1332_v41, %v1187_v56 }
0x10d3   :  { %1034 = vrot.lane.b32.xlu0 %v1033_v60, %s1553_s8  ;;  %v1329_v0 = vmul.f32 -1.442695, %v1019_v63  ;;  %v1218_v60 = vsel %vm355_vm3, %v1202_v58, 0.0  ;;  %v1333_v63 = vld [vmem:[#allocation3] ss:$0 sm:$0xff] }
0x10d5   :  { %1515 = vpow2.f32 %v1329_v0 }
0x10e2   :  { %v1516_v3 = vpop.eup %1515 }
0x10e3   :  { %v1023_v4 = vadd.f32 1.0, %v1516_v3 }
0x10e5   :  { %1517 = vrcp.f32 %v1023_v4 }
0x10f2   :  { %v1518_v5 = vpop.eup %1517 }
0x10f3   :  { %v1044_v38 = vsub.f32 1.0, %v1518_v5  ;;  %v1050_v17 = vmul.f32 %v1518_v5, %v933_v54  ;;  %v1184_v54 = vld [vmem:[#allocation2 + $0x2] sm:$0x3] }
0x10f4   :  { %v1199_v55 = vmul.f32 %v1332_v41, %v1184_v54 }
0x10f6   :  { %v1209_v57 = vsel %vm355_vm3, %v1199_v55, 0.0 }
0x1145   :  { %v1035_v10 = vpop.permute.xlu0 %1034 }
0x1146   :  { %v1037_v11 = vmul.f32 %v1518_v5, %v1035_v10 }
0x1148   :  { %1039 = vrot.lane.b32.xlu1 %v1037_v11, %s1553_s8 }
0x11ba   :  { %v1040_v12 = vpop.permute.xlu1 %1039 }
0x11bb   :  { %v1042_v14 = vadd.f32 %v1040_v12, %v220_v62 }
0x11bd   :  { %1519 = vtanh.f32 %v1042_v14  ;;  %v1257_v14 = vand.u32 127, %v74_v1 }
0x11ca   :  { %v1520_v15 = vpop.eup %1519 }
0x11cb   :  { %1046 = vrot.lane.b32.xlu0 %v1520_v15, %s1554_s3 }
0x123d   :  { %v1047_v16 = vpop.permute.xlu0 %1046 }
0x123e   :  { %v1049_v18 = vmul.f32 %v1047_v16, %v1044_v38  ;;  %v1260_v38 = vsub.s32 %v1257_v14, %v1606_v6 }
0x1240   :  { %v1051_v19 = vadd.f32 %v1050_v17, %v1049_v18 }
0x1242   :  { %v1059_v20 = vrot.slane %v1051_v19, %v1619_v9 }
0x1244   :  { %1060 = vrot.lane.b32.xlu1 %v1059_v20, %s1554_s3 }
0x12b6   :  { %v1061_v21 = vpop.permute.xlu1 %1060 }
0x12b7   :  { %1064 = vst.msk [vmem:[#allocation2 + $0xc] sm:$0x3] %vm355_vm3, %v1061_v21  ;;  %1468 = vmatmul.mubr.msk.f32.vlgmr.msra.gmra.mxu0 %vm237_vm4, %v1061_v21 }
0x12be   :  { %v1189_v59 = vld [vmem:[#allocation2 + $0xc] sm:$0x3] }
0x12bf   :  { %v1204_v61 = vmul.f32 %v1332_v41, %v1189_v59 }
0x12c1   :  { %v1224_v62 = vsel %vm355_vm3, %v1204_v61, 0.0 }
0x1377   :  { %v1133_v23 = vpop.f32.mrf.mxu0 }
0x1378   :  { %v1134_v24 = vadd.f32 %v1692_v31, %v1133_v23 }
0x1379   :  { %v1469_v25 = vpop.f32.mrf.mxu0 }
0x137a   :  { %v1151_v26 = vrot.slane %v1134_v24, %v1619_v9  ;;  %v1137_v28 = vadd.f32 %v1134_v24, %v222_v27 }
0x137c   :  { %1152 = vrot.lane.b32.xlu0 %v1151_v26, %s1553_s8  ;;  %v1331_v29 = vmul.f32 -1.442695, %v1137_v28 }
0x137e   :  { %1521 = vpow2.f32 %v1331_v29 }
0x138b   :  { %v1522_v30 = vpop.eup %1521 }
0x138c   :  { %v1141_v32 = vadd.f32 1.0, %v1522_v30 }
0x138e   :  { %1523 = vrcp.f32 %v1141_v32 }
0x139b   :  { %v1524_v33 = vpop.eup %1523 }
0x139c   :  { %v1162_v48 = vsub.f32 1.0, %v1524_v33  ;;  %v1168_v50 = vmul.f32 %v1524_v33, %v1051_v19 }
0x13ee   :  { %v1153_v34 = vpop.permute.xlu0 %1152 }
0x13ef   :  { %v1155_v35 = vmul.f32 %v1524_v33, %v1153_v34 }
0x13f1   :  { %1157 = vrot.lane.b32.xlu1 %v1155_v35, %s1553_s8 }
0x1463   :  { %v1158_v36 = vpop.permute.xlu1 %1157 }
0x1464   :  { %v1160_v37 = vadd.f32 %v1158_v36, %v222_v27 }
0x1466   :  { %1525 = vtanh.f32 %v1160_v37 }
0x1473   :  { %v1526_v31 = vpop.eup %1525 }
0x1474   :  { %1164 = vrot.lane.b32.xlu0 %v1526_v31, %s1554_s3 }
0x1493   :  { %1207 = vadd.xlane.f32.xlu0 %v1206_v7 }
0x1497   :  { %1213 = vadd.xlane.f32.xlu0 %v1212_v45 }
0x149b   :  { %1216 = vadd.xlane.f32.xlu0 %v1215_v13 }
0x149f   :  { %1222 = vadd.xlane.f32.xlu0 %v1221_v2 }
0x14e6   :  { %v1165_v49 = vpop.permute.xlu0 %1164 }
0x14e7   :  { %v1167_v51 = vmul.f32 %v1165_v49, %v1162_v48 }
0x14e9   :  { %v1169_v52 = vadd.f32 %v1168_v50, %v1167_v51 }
0x14eb   :  { %v1177_v53 = vrot.slane %v1169_v52, %v1619_v9 }
0x14ed   :  { %1178 = vrot.lane.b32.xlu1 %v1177_v53, %s1554_s3 }
0x1511   :  { %1210 = vadd.xlane.f32.xlu1 %v1209_v57 }
0x1515   :  { %1219 = vadd.xlane.f32.xlu1 %v1218_v60 }
0x1519   :  { %1225 = vadd.xlane.f32.xlu1 %v1224_v62 }
0x151c   :  { %v1208_v12 = vpop.xlane.xlu0 %1207 }
0x1520   :  { %v1214_v18 = vpop.xlane.xlu0 %1213 }
0x1524   :  { %v1217_v23 = vpop.xlane.xlu0 %1216 }
0x1528   :  { %v1223_v1 = vpop.xlane.xlu0 %1222 }
0x152a   :  { %1237 = vperm.xlu1 %1477, %v1333_v63  }
0x155f   :  { %v1179_v9 = vpop.permute.xlu1 %1178 }
0x1560   :  { %1182 = vst.msk [vmem:[#allocation2 + $0xe] sm:$0x3] %vm355_vm3, %v1179_v9 }
0x1567   :  { %v1190_v0 = vld [vmem:[#allocation2 + $0xe] sm:$0x3] }
0x1568   :  { %v1205_v3 = vmul.f32 %v1332_v41, %v1190_v0 }
0x156a   :  { %v1227_v4 = vsel %vm355_vm3, %v1205_v3, 0.0 }
0x156b   :  { %1228 = vadd.xlane.f32.xlu0 %v1227_v4 }
0x159a   :  { %v1211_v5 = vpop.xlane.xlu1 %1210 }
0x159e   :  { %v1220_v10 = vpop.xlane.xlu1 %1219 }
0x15a2   :  { %v1226_v11 = vpop.xlane.xlu1 %1225 }
0x15a6   :  { %v1238_v15 = vpop.permute.xlu1 %1237 }
0x15a7   :  { %v1240_v16 = vadd.f32 %v1238_v15, %v1208_v12  ;;  %v1241_v17 = vadd.f32 %v1238_v15, %v1211_v5  ;;  %v1242_v19 = vadd.f32 %v1238_v15, %v1214_v18  ;;  %v1243_v25 = vadd.f32 %v1238_v15, %v1217_v23 }
0x15a8   :  { %v1244_v27 = vadd.f32 %v1238_v15, %v1220_v10  ;;  %v1245_v30 = vadd.f32 %v1238_v15, %v1223_v1  ;;  %v1246_v33 = vadd.f32 %v1238_v15, %v1226_v11 }
0x15a9   :  { %v1261_v20 = vrot.slane %v1240_v16, %v1260_v38  ;;  %v1265_v21 = vrot.slane %v1241_v17, %v1260_v38  ;;  %v1269_v24 = vrot.slane %v1242_v19, %v1260_v38  ;;  %v1273_v29 = vrot.slane %v1243_v25, %v1260_v38 }
0x15aa   :  { %v1277_v32 = vrot.slane %v1244_v27, %v1260_v38  ;;  %v1281_v35 = vrot.slane %v1245_v30, %v1260_v38  ;;  %v1285_v39 = vrot.slane %v1246_v33, %v1260_v38 }
0x15ab   :  { %v1291_v26 = vsel %vm1290_vm5, %v1265_v21, %v1261_v20 }
0x15ac   :  { %v1293_v28 = vsel %vm1292_vm6, %v1269_v24, %v1291_v26 }
0x15ad   :  { %v1295_v6 = vsel %vm1294_vm7, %v1273_v29, %v1293_v28 }
0x15ae   :  { %v1297_v34 = vsel %vm1296_vm8, %v1277_v32, %v1295_v6 }
0x15af   :  { %v1299_v31 = vsel %vm1298_vm9, %v1281_v35, %v1297_v34 }
0x15b0   :  { %v1301_v42 = vsel %vm1300_vm10, %v1285_v39, %v1299_v31 }
0x15f4   :  { %v1229_v36 = vpop.xlane.xlu0 %1228 }
0x15f5   :  { %v1247_v37 = vadd.f32 %v1238_v15, %v1229_v36 }
0x15f7   :  { %v1289_v41 = vrot.slane %v1247_v37, %v1260_v38 }
0x15f9   :  { %v1303_v43 = vsel %vm1302_vm11, %v1289_v41, %v1301_v42 }
0x15fa   :  { %1306 = vst.msk [vmem:[%s1853_s7] sm:$0xff] %vm1305_vm12, %v1303_v43 }
0x15fb   :  { %1311 = vsyncpa [#allocation5], 1 }

</bundles_post_ra>
